<compile_context>
chip_gen: v7x
topology: tpu7x:2x2x1
jax: 0.10.0
libtpu: 0.0.40
codegen_flags: <defaults>
</compile_context>

<pallas_src>
import jax
import jax.numpy as jnp
from jax.experimental import pallas as pl
from jax.experimental.pallas import tpu as pltpu

IN_FEATURES = 57
OUT_FEATURES = 64
SMALL_BATCH_CUTOFF = 256   # <= this: single-shot, no-grid path
DEFAULT_TB = 1024          # batch tile for the grid path (>= roofline knee)


def linear_kernel(x_ref, w_ref, b_ref, o_ref):
    # y = x @ W + b   (W stored as (in_features, out_features), b as (1, out_features))
    acc = jnp.dot(x_ref[...], w_ref[...], preferred_element_type=jnp.float32)
    o_ref[...] = (acc + b_ref[...]).astype(o_ref.dtype)


def prepare_params(w_pt, b):
    """One-time parameter prep: PyTorch weight (out,in) -> (in,out); bias -> (1,out)."""
    w = jnp.asarray(w_pt).T                      # (57, 64)
    b2 = jnp.asarray(b).reshape(1, OUT_FEATURES)  # (1, 64)
    return w, b2


def _round_up(n, m):
    return ((n + m - 1) // m) * m


def linear_pallas(x, w, b, *, tb=DEFAULT_TB):
    """Forward of ExampleActivePartyLocalModule: x (B, 57) -> (B, 64)."""
    B, K = x.shape
    assert K == IN_FEATURES

    if B <= SMALL_BATCH_CUTOFF:
        # Overhead-minimal path: single invocation, whole operands resident in
        # VMEM, no grid / pipeline bookkeeping, output written at true width.
        return pl.pallas_call(
            linear_kernel,
            out_shape=jax.ShapeDtypeStruct((B, OUT_FEATURES), x.dtype),
            in_specs=[
                pl.BlockSpec(memory_space=pltpu.MemorySpace.VMEM),
                pl.BlockSpec(memory_space=pltpu.MemorySpace.VMEM),
                pl.BlockSpec(memory_space=pltpu.MemorySpace.VMEM),
            ],
            out_specs=pl.BlockSpec(memory_space=pltpu.MemorySpace.VMEM),
        )(x, w, b)

    # Batch-tiled path: grid over B, W/b resident (constant index_map).
    # Cap the tile at ~B/2 (rounded to a sublane multiple) so there are always
    # >= 2 tiles for v7x megacore to split across its two TensorCores.
    tb_eff = min(tb, _round_up(pl.cdiv(B, 2), 8))
    n_tiles = pl.cdiv(B, tb_eff)

    bytes_accessed = 4 * (B * K + K * OUT_FEATURES + OUT_FEATURES + B * OUT_FEATURES)
    return pl.pallas_call(
        linear_kernel,
        out_shape=jax.ShapeDtypeStruct((B, OUT_FEATURES), x.dtype),
        grid_spec=pltpu.PrefetchScalarGridSpec(
            num_scalar_prefetch=0,
            grid=(n_tiles,),
            in_specs=[
                pl.BlockSpec((tb_eff, K), lambda i: (i, 0)),            # x streams over B
                pl.BlockSpec((K, OUT_FEATURES), lambda i: (0, 0)),      # W resident
                pl.BlockSpec((1, OUT_FEATURES), lambda i: (0, 0)),      # b resident
            ],
            out_specs=pl.BlockSpec((tb_eff, OUT_FEATURES), lambda i: (i, 0)),
        ),
        compiler_params=pltpu.CompilerParams(
            dimension_semantics=("parallel",)),
        cost_estimate=pl.CostEstimate(
            flops=2 * B * K * OUT_FEATURES,
            transcendentals=0,
            bytes_accessed=bytes_accessed),
    )(x, w, b)


if __name__ == "__main__":
    key = jax.random.PRNGKey(0)
    k_x, k_w, k_b = jax.random.split(key, 3)

    # Deterministic synthetic parameters mimicking nn.Linear(57, 64).
    w_pt = jax.random.normal(k_w, (OUT_FEATURES, IN_FEATURES), dtype=jnp.float32) * 0.1
    b = jax.random.normal(k_b, (OUT_FEATURES,), dtype=jnp.float32) * 0.1
    w_prep, b_prep = prepare_params(w_pt, b)   # one-time prep, not per call

    # Small-batch (no-grid) path.
    B = 8
    x = jax.random.normal(k_x, (B, IN_FEATURES), dtype=jnp.float32)
    y = linear_pallas(x, w_prep, b_prep)
    jax.block_until_ready(y)
    y_ref = x @ w_pt.T + b
    assert y.shape == (B, OUT_FEATURES)
    assert jnp.allclose(y, y_ref, atol=1e-5, rtol=1e-5)

    # Batch-tiled (grid / megacore) path, with a ragged last tile (B not a
    # multiple of the tile) to exercise the masked out-of-bounds writeback.
    B2 = 1000
    x2 = jax.random.normal(k_x, (B2, IN_FEATURES), dtype=jnp.float32)
    y2 = linear_pallas(x2, w_prep, b_prep)
    jax.block_until_ready(y2)
    y2_ref = x2 @ w_pt.T + b
    assert y2.shape == (B2, OUT_FEATURES)
    assert jnp.allclose(y2, y2_ref, atol=1e-4, rtol=1e-4)

    print("KERNEL_OK")
</pallas_src>

<mosaic_0001>
module attributes {stable_mosaic.version = 11 : i64} {
  func.func @linear_kernel(%arg0: memref<8x57xf32, #tpu.memory_space<vmem>>, %arg1: memref<57x64xf32, #tpu.memory_space<vmem>>, %arg2: memref<1x64xf32, #tpu.memory_space<vmem>>, %arg3: memref<8x64xf32, #tpu.memory_space<vmem>>) attributes {dimension_semantics = [], scalar_prefetch = 0 : i64, scratch_operands = 0 : i64, tpu.core_type = #tpu.core_type<tc>} {
    %c0 = arith.constant 0 : index
    %c0_0 = arith.constant 0 : index
    %0 = vector.load %arg0[%c0, %c0_0] : memref<8x57xf32, #tpu.memory_space<vmem>>, vector<8x57xf32>
    %c0_1 = arith.constant 0 : index
    %c0_2 = arith.constant 0 : index
    %1 = vector.load %arg1[%c0_1, %c0_2] : memref<57x64xf32, #tpu.memory_space<vmem>>, vector<57x64xf32>
    %cst = arith.constant dense<0.000000e+00> : vector<8x64xf32>
    %2 = tpu.matmul %0, %1, %cst {dimension_numbers = #tpu.dot_dimension_numbers<[1], [0], [0], [1], [0, 0, 1, 1], [], []>} : vector<8x57xf32>, vector<57x64xf32>, vector<8x64xf32> -> vector<8x64xf32>
    %c0_3 = arith.constant 0 : index
    %c0_4 = arith.constant 0 : index
    %3 = vector.load %arg2[%c0_3, %c0_4] : memref<1x64xf32, #tpu.memory_space<vmem>>, vector<1x64xf32>
    %4 = vector.broadcast %3 : vector<1x64xf32> to vector<8x64xf32>
    %5 = arith.addf %2, %4 : vector<8x64xf32>
    %c0_5 = arith.constant 0 : index
    %c0_6 = arith.constant 0 : index
    %6 = vector.load %arg3[%c0_5, %c0_6] : memref<8x64xf32, #tpu.memory_space<vmem>>, vector<8x64xf32>
    tpu.vector_store %arg3[%c0_5, %c0_6], %5 {strides = array<i32>} : memref<8x64xf32, #tpu.memory_space<vmem>>, vector<8x64xf32>,
    return
  }
}

</mosaic_0001>

<bundles_post_ra>
// kernel: tpu_custom_call.1
= control target key start
LH: loop header
LB: loop body
LE: loop exit
PB: predicated region body
PF: predicated region fallthrough
CT: control target
= control target key end

     0   :  { %8 = vsyncpa [#allocation3], 0  ;;  %s353_s0 = inlined_call_operand.hbm [shape: f32[8,57], index: 0, kind: input, shape index: {}]   ;;  %s354_s1 = inlined_call_operand.hbm [shape: f32[57,64], index: 1, kind: input, shape index: {}]   ;;  %s355_s2 = inlined_call_operand.vmem [shape: f32[1,64], index: 2, kind: input, shape index: {}]   ;;  %s356_s3 = inlined_call_operand.hbm [shape: f32[8,64], index: 3, kind: output, shape index: {}]  }
   0x1   :  { %9 = vsyncpa [#allocation6], 0 }
   0x2   :  { %10 = vsyncpa [#allocation4], 0  ;;  %s278_s12 = smov [#allocation2]   ;;  %s279_s14 = smov [#allocation5]  }
   0x3   :  { %s17_s13 = sshll.u32 %s278_s12, 4  ;;  %s26_s15 = sshll.u32 %s279_s14, 4  ;;  %s18_s13 = int_to_ptr.vmem [resolvable:$true] %s17_s13  ;;  %s307_s15 = int_to_ptr.vmem [resolvable:$true] %s26_s15 }
   0x4   :  { %s206_s18 = scalar_lea.hbm %s353_s0, 128 }
   0x5   :  { %p207_p0 = scmp.ne.s32.totalorder %s353_s0, %s206_s18  ;;  %p210_p1 = scmp.lt.u32.totalorder %s206_s18, %s353_s0 }
   0x7   :  { %p212_p2 = pnand %p210_p1, %p207_p0 }
   0x9   :  { %215 = shalt.err (!%p212_p2)
}
   0xa   :  { %s216_s23 = scalar_lea.vmem %s18_s13, 128  ;;  %p221_p4 = scmp.lt.s32.totalorder %s18_s13, %s18_s13 }
   0xb   :  { %p217_p3 = scmp.ne.s32.totalorder %s18_s13, %s216_s23  ;;  %p222_p5 = scmp.lt.s32.totalorder %s216_s23, %s216_s23 }
   0xd   :  { %p223_p6 = por %p222_p5, %p221_p4 }
   0xf   :  { %p224_p7 = pnand %p223_p6, %p217_p3 }
  0x11   :  { %227 = shalt.err (!%p224_p7)
}
  0x12   :  { %20 = dma.hbm_to_vmem [thread:$0]  %s353_s0, 128, %s18_s13, [#allocation3]  }
  0x13   :  { %s228_s28 = scalar_lea.hbm %s354_s1, 1024 }
  0x14   :  { %p229_p8 = scmp.ne.s32.totalorder %s354_s1, %s228_s28  ;;  %p232_p9 = scmp.lt.u32.totalorder %s228_s28, %s354_s1 }
  0x16   :  { %p234_p10 = pnand %p232_p9, %p229_p8 }
  0x18   :  { %237 = shalt.err (!%p234_p10)
}
  0x19   :  { %s238_s6 = scalar_lea.vmem %s307_s15, 1024  ;;  %p243_p12 = scmp.lt.s32.totalorder %s307_s15, %s307_s15 }
  0x1a   :  { %p239_p11 = scmp.ne.s32.totalorder %s307_s15, %s238_s6  ;;  %p244_p13 = scmp.lt.s32.totalorder %s238_s6, %s238_s6 }
  0x1c   :  { %p245_p0 = por %p244_p13, %p243_p12 }
  0x1e   :  { %p246_p1 = pnand %p245_p0, %p239_p11 }
  0x20   :  { %249 = shalt.err (!%p246_p1)
}
  0x21   :  { %s280_s0 = smov 128   ;;  %s281_s7 = smov 8  }
  0x22   :  { %32 = dma.hbm_to_vmem [thread:$0]  %s354_s1, 1024, %s307_s15, [#allocation6], %s280_s0, %s280_s0, %s281_s7  }
  0x23   :  { %272 = dma.done.wait [#allocation3], 128  }
  0x24   :  { %273 = vsyncadd [#allocation3], 4294967168 }
  0x25   :  { %274 = dma.done.wait [#allocation6], 1024  }
  0x26   :  { %275 = vsyncadd [#allocation6], 4294966272  ;;  %v282_v0 = vmov 0.0|0.0   ;;  %vm283_vm0 = vmmov 0   ;;  %v284_v1 = vmov 0.0   ;;  %v42_v2 = vld [vmem:[#allocation5] sm:$0xff] }
  0x27   :  { %184 = vmatprep.subr.bf16.mxu0 %v282_v0  ;;  %181 = vmatprep.mubr.msk.f32.mxu0 %vm283_vm0, %v284_v1  ;;  %v43_v3 = vld [vmem:[#allocation5 + $0x8] sm:$0xff]  ;;  %v44_v4 = vld [vmem:[#allocation5 + $0x10] sm:$0xff]  ;;  %v45_v6 = vld [vmem:[#allocation5 + $0x18] sm:$0xff]  ;;  %vm61_vm1 = vcmask 1040384   ;;  %vm285_vm2 = vmmov 1   ;;  %vm57_vm4 = vcmask 465920  }
  0x28   :  { %v185_v5 = vpack.c.bf16 %v43_v3, %v42_v2  ;;  %v188_v7 = vpack.c.bf16 %v45_v6, %v44_v4  ;;  %v46_v8 = vld [vmem:[#allocation5 + $0x20] sm:$0xff]  ;;  %v47_v9 = vld [vmem:[#allocation5 + $0x28] sm:$0xff]  ;;  %v48_v11 = vld [vmem:[#allocation5 + $0x30] sm:$0xff]  ;;  %s286_s11 = smov [#allocation7]   ;;  %vm135_vm5 = vcmask 523264  }
  0x29   :  { %v191_v10 = vpack.c.bf16 %v47_v9, %v46_v8  ;;  %v49_v12 = vld [vmem:[#allocation5 + $0x38] sm:$0x1]  ;;  %vm195_vm3 = vmpackc.low %vm61_vm1, %vm285_vm2  ;;  %s143_s12 = sshll.u32 %s286_s11, 4  ;;  %s144_s12 = int_to_ptr.vmem [resolvable:$true] %s143_s12 }
  0x2a   :  { %186 = vmatpush3.bf16.msra.mxu0 %v185_v5  ;;  %v194_v13 = vpack.c.bf16 %v49_v12, %v48_v11  ;;  %v41_v14 = vld [vmem:[#allocation2] sm:$0xff]  ;;  %s250_s13 = scalar_lea.vmem %s144_s12, 128  ;;  %p255_p3 = scmp.lt.s32.totalorder %s144_s12, %s144_s12 }
  0x2b   :  { %187 = vmatprep.subr.bf16.mxu0 %v282_v0  ;;  %v153_v15 = vld [vmem:[%s355_s2] ss:$0 sm:$0xff]  ;;  %p251_p2 = scmp.ne.s32.totalorder %s144_s12, %s250_s13  ;;  %p256_p4 = scmp.lt.s32.totalorder %s250_s13, %s250_s13 }
  0x2d   :  { %p257_p5 = por %p256_p4, %p255_p3 }
  0x2e   :  { %189 = vmatpush3.bf16.msra.mxu0 %v188_v7 }
  0x2f   :  { %190 = vmatprep.subr.bf16.mxu0 %v282_v0  ;;  %p258_p6 = pnand %p257_p5, %p251_p2 }
  0x32   :  { %192 = vmatpush3.bf16.msra.mxu0 %v191_v10 }
  0x33   :  { %193 = vmatprep.subr.bf16.mxu0 %v282_v0 }
  0x36   :  { %196 = vmatpush3.bf16.msk.msra.mxu0 %vm195_vm3, %v194_v13 }
  0x39   :  { %182 = vmatmul.mubr.msk.f32.vlgmr.msra.gmra.mrb[0].mxu0 %vm57_vm4, %v41_v14 }
 0x10c   :  { %v131_v16 = vpop.f32.mrb[0].mxu0 }
 0x10d   :  { %v132_v17 = vadd.f32 %v153_v15, %v131_v16  ;;  %v183_v18 = vpop.f32.mrb[1].mxu0 }
 0x10f   :  { %136 = vst.msk [vmem:[#allocation7] sm:$0xff] %vm135_vm5, %v132_v17 }
 0x110   :  { %261 = shalt.err (!%p258_p6)
}
 0x111   :  { %s262_s16 = scalar_lea.hbm %s356_s3, 128 }
 0x112   :  { %p263_p7 = scmp.ne.s32.totalorder %s356_s3, %s262_s16  ;;  %p266_p8 = scmp.lt.u32.totalorder %s262_s16, %s356_s3 }
 0x114   :  { %p268_p9 = pnand %p266_p8, %p263_p7 }
 0x116   :  { %271 = shalt.err (!%p268_p9)
}
 0x117   :  { %146 = dma.vmem_to_hbm [thread:$0]  %s144_s12, 128, %s356_s3, [#allocation4]  }
 0x118   :  { %276 = dma.done.wait [#allocation4], 128  }
 0x119   :  { %277 = vsyncadd [#allocation4], 4294967168 }
 0x11a   :  { %150 = vsyncpa [#allocation3], 1 }
 0x11b   :  { %151 = vsyncpa [#allocation6], 1 }
 0x11c   :  { %152 = vsyncpa [#allocation4], 1 }

</bundles_post_ra>
